<compile_context>
chip_gen: v5e
topology: v5e:2x2
jax: 0.10.0
libtpu: 0.0.40
codegen_flags: <defaults>
</compile_context>

<pallas_src>
import jax
import jax.numpy as jnp
from jax.experimental import pallas as pl
from jax.experimental.pallas import tpu as pltpu


def outconv_kernel(x_ref, w_ref, b_ref, o_ref):
    # x_ref: (Cin, TP)  w_ref: (Cout, Cin)  b_ref: (Cout, 1)  o_ref: (Cout, TP)
    acc = jnp.dot(w_ref[...], x_ref[...], preferred_element_type=jnp.float32)
    o_ref[...] = (acc + b_ref[...]).astype(o_ref.dtype)


def _pick_pixel_tile(hw, n_batch, target=32768, min_total_tiles=8,
                     min_tile=8192):
    """Pick the pixel-tile size TP (lane axis) for the 1x1 conv.

    * hw <= target : one full-extent block per batch element (always a legal
      block shape, no padding, no masked tail).
    * hw  > target : TP is a multiple of 128; grid uses cdiv(hw, TP) with an
      edge-masked tail block.
    * v7x balance : shrink TP (keeping it >= min_tile, a multiple of 128) so
      that n_batch * n_tiles >= min_total_tiles when possible.
    """
    if hw <= target:
        tp = hw
    else:
        tp = (target // 128) * 128
    # Megacore balance: prefer enough tiles for both TensorCores.
    while (tp % 256 == 0 and tp > min_tile
           and n_batch * pl.cdiv(hw, tp) < min_total_tiles):
        tp //= 2
    return tp


def out_conv(x, weight, bias, *, target_tile=32768):
    """1x1 Conv2d forward (UNet OutConv).

    x:      (N, Cin, H, W)   float32 or bfloat16
    weight: (Cout, Cin, 1, 1)
    bias:   (Cout,)
    returns (N, Cout, H, W) in x.dtype
    """
    N, Cin, H, W = x.shape
    Cout = weight.shape[0]
    HW = H * W

    x3d = x.reshape(N, Cin, HW)                    # free reshape, stays NCHW
    w2d = weight.reshape(Cout, Cin).astype(x.dtype)  # resident in VMEM
    b2d = bias.reshape(Cout, 1).astype(jnp.float32)  # f32 bias add pre-cast

    tp = _pick_pixel_tile(HW, N, target_tile)
    grid = (N, pl.cdiv(HW, tp))

    cost = pl.CostEstimate(
        flops=2 * N * HW * Cin * Cout,
        transcendentals=0,
        bytes_accessed=(x.dtype.itemsize * N * HW * (Cin + Cout)
                        + x.dtype.itemsize * Cout * Cin + 4 * Cout),
    )

    out3d = pl.pallas_call(
        outconv_kernel,
        out_shape=jax.ShapeDtypeStruct((N, Cout, HW), x.dtype),
        grid=grid,
        in_specs=[
            pl.BlockSpec((None, Cin, tp), lambda n, p: (n, 0, p)),
            pl.BlockSpec((Cout, Cin), lambda n, p: (0, 0)),
            pl.BlockSpec((Cout, 1), lambda n, p: (0, 0)),
        ],
        out_specs=pl.BlockSpec((None, Cout, tp), lambda n, p: (n, 0, p)),
        compiler_params=pltpu.CompilerParams(
            dimension_semantics=("parallel", "parallel")),
        cost_estimate=cost,
    )(x3d, w2d, b2d)

    return out3d.reshape(N, Cout, H, W)


def _ref_out_conv(x, weight, bias):
    Cout, Cin = weight.shape[0], weight.shape[1]
    return (jnp.einsum("nchw,oc->nohw", x.astype(jnp.float32),
                       weight.reshape(Cout, Cin).astype(jnp.float32))
            + bias.reshape(1, Cout, 1, 1)).astype(x.dtype)


if __name__ == "__main__":
    key = jax.random.PRNGKey(0)
    kx, kw, kb, kx2 = jax.random.split(key, 4)

    # UNet head is OutConv(16, n_classes); small, module-consistent shapes.
    N, Cin, Cout, Hs, Ws = 2, 16, 3, 16, 16

    x = jax.random.normal(kx, (N, Cin, Hs, Ws), dtype=jnp.float32)
    weight = jax.random.normal(kw, (Cout, Cin, 1, 1), dtype=jnp.float32) * 0.1
    bias = jax.random.normal(kb, (Cout,), dtype=jnp.float32) * 0.1

    # 1) Standard path: HW is a multiple of 128, single full-extent tile.
    out = jax.block_until_ready(out_conv(x, weight, bias))
    ref = _ref_out_conv(x, weight, bias)
    assert out.shape == (N, Cout, Hs, Ws)
    assert jnp.allclose(out, ref, atol=1e-5, rtol=1e-5)

    # 2) cdiv / edge-masked-tail path: HW=324 is not a multiple of the tile,
    #    force a small target so the grid has a masked last block.
    x2 = jax.random.normal(kx2, (N, Cin, 18, 18), dtype=jnp.float32)
    out2 = jax.block_until_ready(out_conv(x2, weight, bias, target_tile=128))
    ref2 = _ref_out_conv(x2, weight, bias)
    assert out2.shape == (N, Cout, 18, 18)
    assert jnp.allclose(out2, ref2, atol=1e-5, rtol=1e-5)

    print("KERNEL_OK")
</pallas_src>

<mosaic_0001>
module attributes {stable_mosaic.version = 11 : i64} {
  func.func @outconv_kernel(%arg0: i32, %arg1: i32, %arg2: memref<1x16x256xf32, #tpu.memory_space<vmem>>, %arg3: memref<3x16xf32, #tpu.memory_space<vmem>>, %arg4: memref<3x1xf32, #tpu.memory_space<vmem>>, %arg5: memref<1x3x256xf32, #tpu.memory_space<vmem>>) attributes {dimension_semantics = [#tpu.dimension_semantics<parallel>, #tpu.dimension_semantics<parallel>], iteration_bounds = array<i64: 2, 1>, scalar_prefetch = 0 : i64, scratch_operands = 0 : i64, tpu.core_type = #tpu.core_type<tc>, window_params = [{transform_indices = @transform_0, window_bounds = array<i64: 1, 16, 256>}, {pipeline_mode = #tpu.pipeline_mode<synchronous>, transform_indices = @transform_1, window_bounds = array<i64: 3, 16>}, {pipeline_mode = #tpu.pipeline_mode<synchronous>, transform_indices = @transform_2, window_bounds = array<i64: 3, 1>}, {transform_indices = @transform_3, window_bounds = array<i64: 1, 3, 256>}]} {
    %c0 = arith.constant 0 : index
    %c0_0 = arith.constant 0 : index
    %0 = vector.load %arg3[%c0, %c0_0] : memref<3x16xf32, #tpu.memory_space<vmem>>, vector<3x16xf32>
    %c0_1 = arith.constant 0 : index
    %c0_2 = arith.constant 0 : index
    %c0_3 = arith.constant 0 : index
    %1 = vector.load %arg2[%c0_1, %c0_2, %c0_3] : memref<1x16x256xf32, #tpu.memory_space<vmem>>, vector<1x16x256xf32>
    %2 = vector.shape_cast %1 : vector<1x16x256xf32> to vector<16x256xf32>
    %cst = arith.constant dense<0.000000e+00> : vector<3x256xf32>
    %3 = tpu.matmul %0, %2, %cst {dimension_numbers = #tpu.dot_dimension_numbers<[1], [0], [0], [1], [0, 0, 1, 1], [], []>} : vector<3x16xf32>, vector<16x256xf32>, vector<3x256xf32> -> vector<3x256xf32>
    %c0_4 = arith.constant 0 : index
    %c0_5 = arith.constant 0 : index
    %4 = vector.load %arg4[%c0_4, %c0_5] : memref<3x1xf32, #tpu.memory_space<vmem>>, vector<3x1xf32>
    %5 = vector.broadcast %4 : vector<3x1xf32> to vector<3x256xf32>
    %6 = arith.addf %3, %5 : vector<3x256xf32>
    %c0_6 = arith.constant 0 : index
    %c0_7 = arith.constant 0 : index
    %c0_8 = arith.constant 0 : index
    %7 = vector.load %arg5[%c0_6, %c0_7, %c0_8] : memref<1x3x256xf32, #tpu.memory_space<vmem>>, vector<1x3x256xf32>
    %8 = vector.shape_cast %7 : vector<1x3x256xf32> to vector<3x256xf32>
    %9 = vector.shape_cast %6 : vector<3x256xf32> to vector<1x3x256xf32>
    tpu.vector_store %arg5[%c0_6, %c0_7, %c0_8], %9 {strides = array<i32>} : memref<1x3x256xf32, #tpu.memory_space<vmem>>, vector<1x3x256xf32>,
    return
  }
  func.func @transform_0(%arg0: i32, %arg1: i32) -> (i32, i32, i32) {
    %c0_i32 = arith.constant 0 : i32
    %c0_i32_0 = arith.constant 0 : i32
    return %arg0, %c0_i32, %arg1 : i32, i32, i32
  }
  func.func @transform_1(%arg0: i32, %arg1: i32) -> (i32, i32) {
    %c0_i32 = arith.constant 0 : i32
    %c0_i32_0 = arith.constant 0 : i32
    %c0_i32_1 = arith.constant 0 : i32
    return %c0_i32, %c0_i32_0 : i32, i32
  }
  func.func @transform_2(%arg0: i32, %arg1: i32) -> (i32, i32) {
    %c0_i32 = arith.constant 0 : i32
    %c0_i32_0 = arith.constant 0 : i32
    %c0_i32_1 = arith.constant 0 : i32
    return %c0_i32, %c0_i32_0 : i32, i32
  }
  func.func @transform_3(%arg0: i32, %arg1: i32) -> (i32, i32, i32) {
    %c0_i32 = arith.constant 0 : i32
    %c0_i32_0 = arith.constant 0 : i32
    return %arg0, %c0_i32, %arg1 : i32, i32, i32
  }
}

</mosaic_0001>

<bundles_post_ra>
// kernel: tpu_custom_call.1
= control target key start
LH: loop header
LB: loop body
LE: loop exit
PB: predicated region body
PF: predicated region fallthrough
CT: control target
= control target key end

     0   :  { %8 = vsyncpa [#allocation3], 0  ;;  %s653_s0 = inlined_call_operand.hbm [shape: f32[2,16,256], index: 0, kind: input, shape index: {}]   ;;  %s654_s1 = inlined_call_operand.vmem [shape: f32[3,16], index: 1, kind: input, shape index: {}]   ;;  %s655_s2 = inlined_call_operand.vmem [shape: f32[3,1], index: 2, kind: input, shape index: {}]   ;;  %s656_s3 = inlined_call_operand.vmem [shape: f32[2,3,256], index: 3, kind: output, shape index: {}]  }
   0x1   :  { %10 = vsyncpa [#allocation3 + $0x1], 0  ;;  %s559_s12 = smov 0   ;;  %s561_s13 = smov 0  }
   0x2   :  { %s563_s14 = smov 0   ;;  %s565_s15 = smov 0  }
   0x3   :  { %s567_s16 = smov 0   ;;  %s569_s17 = smov 0  }
   0x4 LB: > { %s378_s18 = sadd.s32 4294967295, %s534_s17   ;;  %s28_s19 = sadd.s32 1, %s530_s16  ;;  %s534_s17 = sphi %s569_s17, %s16_s17   ;;  %s530_s16 = sphi %s567_s16, %s663_s16   ;;  %s526_s15 = sphi %s565_s15, %s662_s15   ;;  %s522_s14 = sphi %s563_s14, %s661_s14   ;;  %s518_s13 = sphi %s561_s13, %s660_s13   ;;  %s514_s12 = sphi %s559_s12, %s659_s12  }
   0x5   : > { %p30_p0 = scmp.ge.s32.totalorder %s28_s19, 2  ;;  %s37_s20 = sadd.s32 1, %s522_s14 }
   0x6   : > { %p44_p1 = scmp.ne.s32.totalorder %s522_s14, %s518_s13  ;;  %p45_p2 = scmp.eq.s32.totalorder %s534_s17, 0 }
   0x7   : > { %s665_s19 = smov (%p30_p0, %s28_s19), 0  ;;  %p50_p4 = scmp.ne.s32.totalorder %s518_s13, %s514_s12 }
   0x8   : > { %p595_p3 = por %p45_p2, %p44_p1  ;;  %s32_s22 = ssub.s32 %s530_s16, %s665_s19 }
   0x9   : > { %p51_p5 = scmp.eq.s32.totalorder %s378_s18, 0  ;;  %p35_p6 = scmp.eq.s32.totalorder %s32_s22, 0 }
   0xa   : > { %p401_p8 = scmp.lt.s32.totalorder %s534_s17, 2  ;;  %s150_s25 = sand.u32 1, %s522_s14  }
   0xb   : > { %p602_p7 = por %p51_p5, %p50_p4  ;;  %s393_s26 = sshll.u32 %s530_s16, 5 }
   0xc   : > { %s608_s24 = scalar_select %p35_p6, %s522_s14, %s37_s20  }
   0xd   : > { %s382_s27 = sshll.u32 %s150_s25, 5  ;;  %s161_s30 = scalar_lea.hbm %s653_s0, %s393_s26 }
   0xe   : > { %s162_s4 = sshll.u32 %s161_s30, 4  ;;  %s154_s5 = scalar_lea.vmem [#allocation2], %s382_s27  ;;  %s163_s4 = int_to_ptr.hbm [resolvable:$true] %s162_s4 }
   0xf   : > { %s164_s6 = sshll.u32 %s154_s5, 4  ;;  %p398_p9 = pnand %p401_p8, %p595_p3  ;;  %s165_s6 = int_to_ptr.vmem [resolvable:$true] %s164_s6 }
  0x10   : > { %p385_p10 = scmp.ge.s32.totalorder %s534_s17, 1  ;;  %p172_p11 = scmp.lt.s32.totalorder %s534_s17, 3 }
  0x11   : > { %s151_s7 = scalar_lea.sflag [#allocation3], %s150_s25  ;;  %s536_s8 = smov 256  }
  0x12   : > { %s537_s9 = smov 16   ;;  %p173_p12 = pnand %p385_p10, %p172_p11 }
  0x13   : > { %400 = dma.hbm_to_vmem [thread:$0]  (!%p398_p9), %s163_s4, 512, %s165_s6, %s151_s7, %s536_s8, %s536_s8, %s537_s9  }
  0x14   : > { %176 = sbr.rel (%p173_p12) target bundleno = 163 (0xa3), region = 32  ;;  %s178_s10 = sand.u32 (!%p173_p12), 1, %s518_s13  }
  0x15   : > { %s386_s11 = sshll.u32 (!%p173_p12), %s178_s10, 5  ;;  %s179_s12 = scalar_lea.sflag (!%p173_p12), [#allocation3], %s178_s10 }
  0x16   : > { %s182_s18 = scalar_lea.vmem (!%p173_p12), [#allocation2], %s386_s11 }
  0x19   : > { %509 = dma.done.wait (%p602_p7), %s179_s12, 512  }
  0x1a   : > { %511 = vsyncadd (%p602_p7), %s179_s12, 4294966784  ;;  %v538_v0 = vmov 0   ;;  %v224_v1 = vld [vmem:[%s182_s18 + $0x10] sm:$0xff]  ;;  %v225_v2 = vld [vmem:[%s182_s18 + $0x18] sm:$0xff]  ;;  %vm232_vm0 = vcmask 130048   ;;  %p212_p13 = scmp.lt.s32.totalorder %s526_s15, 1 }
  0x1b   : > { %453 = vset.pattern.permute.xlu0 %v538_v0  ;;  %v222_v3 = vld [vmem:[%s182_s18] sm:$0xff]  ;;  %250 = vmatpush.msra.mxu0 %v224_v1  ;;  %v223_v4 = vld [vmem:[%s182_s18 + $0x8] sm:$0xff]  ;;  %vm279_vm1 = vcmask 1043456  }
  0x1c   : > { %270 = vmatpush.msra.mxu1 %v225_v2  ;;  %v221_v5 = vld [vmem:[%s654_s1] sm:$0x7]  ;;  %s667_s15 = smov (!%p212_p13, %s526_s15), 1 }
  0x1d   : > { %v226_v6 = vld [vmem:[%s655_s2] sm:$0x7]  ;;  %251 = vmatpush.msra.mxu0 %v222_v3  ;;  %s394_s23 = sshll.u32 %s667_s15, 3 }
  0x1e   : > { %229 = vperm.xlu0 %453, %v226_v6   ;;  %271 = vmatpush.msra.mxu1 %v223_v4  ;;  %s219_s28 = scalar_lea.vmem %s656_s3, %s394_s23 }
  0x1f   : > { %389 = vmatmul.msk.f32.vlgmr.msra.gmra.mxu0 %vm232_vm0, %v221_v5  ;;  %390 = vmatmul.msk.f32.vlgmr.msra.gmra.mxu1 %vm232_vm0, %v221_v5 }
  0x90   : > { %v230_v7 = vpop.permute.xlu0 %229 }
  0x9c   : > { %v253_v8 = vpop.f32.mrf.mxu0  ;;  %v273_v9 = vpop.f32.mrf.mxu1 }
  0x9d   : > { %v274_v10 = vadd.f32 %v273_v9, %v230_v7  ;;  %v254_v11 = vadd.f32 %v253_v8, %v230_v7 }
  0x9f   : > { %v278_v12 = vrot.slane %v274_v10, 4 }
  0xa1   : > { %v280_v13 = vsel %vm279_vm1, %v254_v11, %v278_v12 }
  0xa2   : > { %282 = vst [vmem:[%s219_s28] sm:$0x77] %v280_v13 }
  0xa3 PF: > { %s16_s17 = sadd.s32 1, %s534_s17   ;;  %s659_s12 = smov %s518_s13 }
  0xa4   : > { %p13_p0 = scmp.ge.s32.totalorder %s16_s17, 4   ;;  %s660_s13 = smov %s522_s14 }
  0xa5   : > { %s661_s14 = smov %s608_s24  ;;  %s662_s15 = smov %s530_s16 }
  0xa6   : > { %s663_s16 = smov %s665_s19  ;;  %15 = sbr.rel (!%p13_p0) target bundleno = 4 (0x4), region = 72 }
  0xab   :  { %313 = vsyncpa [#allocation3], 1 }
  0xac   :  { %315 = vsyncpa [#allocation3 + $0x1], 1 }

</bundles_post_ra>
